<compile_context>
chip_gen: v5e
topology: v5e:2x2
jax: 0.10.0
libtpu: 0.0.40
codegen_flags: <defaults>
</compile_context>

<pallas_src>
import functools
import math

import jax
import jax.numpy as jnp
from jax import lax
from jax.experimental import pallas as pl
from jax.experimental.pallas import tpu as pltpu


_NN = (((1,), (0,)), ((), ()))   # x @ w          (w pre-transposed to (D_in, D_out))
_NT = (((1,), (1,)), ((), ()))   # x @ y.T        (Q @ K^T)


def _round_up(x, m):
    return (x + m - 1) // m * m


def _divisor_tile(n, target, multiple):
    """Largest divisor of n that is <= target and a multiple of `multiple`; else n."""
    if n <= target:
        return n
    t = (target // multiple) * multiple
    while t >= multiple:
        if n % t == 0:
            return t
        t -= multiple
    return n


# ----------------------------------------------------------------------------
# Fused linear projections:  y_i = x_i @ W_i + b_i   (M/N/K tiled, f32 acc)
# ----------------------------------------------------------------------------
def _multi_linear_kernel(*refs, n, nk):
    xs = refs[:n]
    ws = refs[n:2 * n]
    bs = refs[2 * n:3 * n]
    outs = refs[3 * n:4 * n]
    accs = refs[4 * n:5 * n]
    k = pl.program_id(2)
    for x_ref, w_ref, b_ref, o_ref, acc_ref in zip(xs, ws, bs, outs, accs):
        @pl.when(k == 0)
        def _init(acc_ref=acc_ref):
            acc_ref[...] = jnp.zeros_like(acc_ref)

        acc_ref[...] += lax.dot_general(
            x_ref[...], w_ref[...], _NN, preferred_element_type=jnp.float32)

        @pl.when(k == nk - 1)
        def _fin(acc_ref=acc_ref, b_ref=b_ref, o_ref=o_ref):
            o_ref[...] = (acc_ref[...] + b_ref[...]).astype(o_ref.dtype)


def multi_linear(xs, params_list, *, out_dtype):
    """Fused projections.  xs: list of (N, D_in) arrays (same shape).
    params_list: list of (wT, b) with wT pre-transposed to (D_in, D_out),
    b shaped (1, D_out) float32."""
    n = len(xs)
    N, d_in = xs[0].shape
    d_out = params_list[0][0].shape[1]
    ws = [p[0] for p in params_list]
    bs = [p[1] for p in params_list]

    # Row (M) tiling with padding -> no single oversized block for awkward N.
    tm = min(512, _round_up(max(N, 8), 8))
    rows = _round_up(N, tm)
    if rows != N:
        xs = [jnp.pad(x, ((0, rows - N), (0, 0))) for x in xs]

    # N / K tiling: multiples of 128 when they divide, else full extent.
    tn = _divisor_tile(d_out, 512, 128)
    tk = _divisor_tile(d_in, 512, 128)
    grid = (rows // tm, d_out // tn, d_in // tk)
    nk = grid[2]

    in_specs = (
        [pl.BlockSpec((tm, tk), lambda m, nn, kk: (m, kk)) for _ in range(n)]
        + [pl.BlockSpec((tk, tn), lambda m, nn, kk: (kk, nn)) for _ in range(n)]
        + [pl.BlockSpec((1, tn), lambda m, nn, kk: (0, nn)) for _ in range(n)]
    )
    out_specs = tuple(
        pl.BlockSpec((tm, tn), lambda m, nn, kk: (m, nn)) for _ in range(n))
    out_shape = tuple(
        jax.ShapeDtypeStruct((rows, d_out), out_dtype) for _ in range(n))
    scratch = [pltpu.VMEM((tm, tn), jnp.float32) for _ in range(n)]

    outs = pl.pallas_call(
        functools.partial(_multi_linear_kernel, n=n, nk=nk),
        out_shape=out_shape,
        grid=grid,
        in_specs=in_specs,
        out_specs=out_specs,
        scratch_shapes=scratch,
        compiler_params=pltpu.CompilerParams(
            dimension_semantics=("parallel", "parallel", "arbitrary"),
            vmem_limit_bytes=64 * 1024 * 1024),
    )(*xs, *ws, *bs)
    outs = list(outs)
    if rows != N:
        outs = [o[:N] for o in outs]
    return outs


# ----------------------------------------------------------------------------
# Attention: grid = (batch, Sq tiles); all heads of the block per grid step.
# ----------------------------------------------------------------------------
def _mha_body(q_ref, k_ref, v_ref, km_ref, vm_ref, m_ref, o_ref, w_ref,
              *, scale, num_heads, depth, mask_heads, approx_recip):
    q = q_ref[0] * scale                                     # (TQ, D), scale folded once
    kcat = jnp.concatenate([k_ref[0], km_ref[0]], axis=0)    # (Skt, D), no HBM concat
    vcat = jnp.concatenate([v_ref[0], vm_ref[0]], axis=0)    # (Skt, D)

    neg = None
    if m_ref is not None:
        neg = m_ref[0].astype(jnp.float32) * (-1e9)          # (mask_heads, TQ, Skt)

    head_outs = []
    for h in range(num_heads):
        lo = h * depth
        hi = lo + depth
        qh = q[:, lo:hi]
        kh = kcat[:, lo:hi]
        vh = vcat[:, lo:hi]

        # Single QK^T over sequence+memory keys (no per-head logits concat).
        logits = lax.dot_general(qh, kh, _NT, preferred_element_type=jnp.float32)
        if neg is not None:
            logits = logits + neg[h if mask_heads > 1 else 0]

        logits = logits - jnp.max(logits, axis=-1, keepdims=True)
        p = jnp.exp(logits)
        denom = jnp.sum(p, axis=-1, keepdims=True)
        p = p * pl.reciprocal(denom, approx=approx_recip)

        w_ref[0, h] = p
        head_outs.append(
            jnp.dot(p.astype(vh.dtype), vh, preferred_element_type=jnp.float32))

    # Single lane-dense (TQ, D) store for this block's attention output.
    o_ref[0] = jnp.concatenate(head_outs, axis=-1).astype(o_ref.dtype)


def _mha_kernel(q_ref, k_ref, v_ref, km_ref, vm_ref, o_ref, w_ref, **kw):
    _mha_body(q_ref, k_ref, v_ref, km_ref, vm_ref, None, o_ref, w_ref, **kw)


def _mha_kernel_masked(q_ref, k_ref, v_ref, km_ref, vm_ref, m_ref, o_ref, w_ref, **kw):
    _mha_body(q_ref, k_ref, v_ref, km_ref, vm_ref, m_ref, o_ref, w_ref, **kw)


def _pick_tq(Sq, num_heads, Skt, D, itemsize):
    """Sq tile sized against a VMEM budget (double-buffered blocks that scale with TQ)."""
    budget = 24 * 1024 * 1024
    per_row = 2 * (num_heads * Skt * 4 + D * 4 + D * itemsize + Skt * 4)
    tq = budget // max(per_row, 1)
    tq = max(8, min(256, (tq // 8) * 8))
    return min(tq, _round_up(max(Sq, 8), 8))


def attention(qp, kp, vp, k_mem, v_mem, mask, num_heads, scale, *,
              approx_recip, out_dtype):
    """qp: (B, Sq, D); kp/vp: (B, Sk, D); k_mem/v_mem: (1, M, D)."""
    B, Sq, D = qp.shape
    Sk = kp.shape[1]
    M = k_mem.shape[1]
    Skt = Sk + M
    depth = D // num_heads

    itemsize = jnp.dtype(qp.dtype).itemsize
    tq = _pick_tq(Sq, num_heads, Skt, D, itemsize)
    sq_pad = _round_up(max(Sq, tq), tq)
    if sq_pad != Sq:
        qp = jnp.pad(qp, ((0, 0), (0, sq_pad - Sq), (0, 0)))

    grid = (B, sq_pad // tq)
    in_specs = [
        pl.BlockSpec((1, tq, D), lambda b, qi: (b, qi, 0)),
        pl.BlockSpec((1, Sk, D), lambda b, qi: (b, 0, 0)),
        pl.BlockSpec((1, Sk, D), lambda b, qi: (b, 0, 0)),
        pl.BlockSpec((1, M, D), lambda b, qi: (0, 0, 0)),   # shared across batch
        pl.BlockSpec((1, M, D), lambda b, qi: (0, 0, 0)),
    ]
    args = [qp, kp, vp, k_mem, v_mem]

    kw = dict(scale=scale, num_heads=num_heads, depth=depth,
              approx_recip=approx_recip)
    if mask is not None:
        # Keep the head dim un-broadcast unless the user supplied per-head masks.
        mh = num_heads if (mask.ndim >= 3 and mask.shape[-3] == num_heads) else 1
        mask_b = jnp.broadcast_to(mask, (B, mh, Sq, Skt)).astype(jnp.float32)
        if sq_pad != Sq:
            mask_b = jnp.pad(mask_b, ((0, 0), (0, 0), (0, sq_pad - Sq), (0, 0)))
        in_specs.append(pl.BlockSpec((1, mh, tq, Skt), lambda b, qi: (b, 0, qi, 0)))
        args.append(mask_b)
        kernel = functools.partial(_mha_kernel_masked, mask_heads=mh, **kw)
    else:
        kernel = functools.partial(_mha_kernel, mask_heads=1, **kw)

    out_shape = (jax.ShapeDtypeStruct((B, sq_pad, D), out_dtype),
                 jax.ShapeDtypeStruct((B, num_heads, sq_pad, Skt), jnp.float32))
    out_specs = (pl.BlockSpec((1, tq, D), lambda b, qi: (b, qi, 0)),
                 pl.BlockSpec((1, num_heads, tq, Skt), lambda b, qi: (b, 0, qi, 0)))

    out, w = pl.pallas_call(
        kernel,
        out_shape=out_shape,
        grid=grid,
        in_specs=in_specs,
        out_specs=out_specs,
        compiler_params=pltpu.CompilerParams(
            dimension_semantics=("parallel", "parallel"),
            vmem_limit_bytes=64 * 1024 * 1024),
    )(*args)

    if sq_pad != Sq:
        out = out[:, :Sq]
        w = w[:, :, :Sq]
    return out, w
    # TODO(synk): for very long Sk add flash-style K tiling (online softmax) so
    # the (Sk, D) K/V blocks stay VMEM-bounded; optionally emit weights in bf16
    # / pad Skt to 128 lanes and fuse the final dense into the epilogue.


# ----------------------------------------------------------------------------
# Parameter init (deterministic, synthetic)
# ----------------------------------------------------------------------------
def init_params(key, d_model, num_memory):
    keys = jax.random.split(key, 14)

    def lin(kw, kb):
        w = jax.random.normal(kw, (d_model, d_model), jnp.float32) * 0.05
        b = jax.random.normal(kb, (d_model,), jnp.float32) * 0.05
        return (w, b)

    return {
        "wq": lin(keys[0], keys[1]),
        "wk": lin(keys[2], keys[3]),
        "wv": lin(keys[4], keys[5]),
        "k_w": lin(keys[6], keys[7]),
        "v_w": lin(keys[8], keys[9]),
        "dense": lin(keys[10], keys[11]),
        "k_memory": jax.random.normal(keys[12], (1, num_memory, d_model), jnp.float32),
        "v_memory": jax.random.normal(keys[13], (1, num_memory, d_model), jnp.float32),
    }


# ----------------------------------------------------------------------------
# Forward pass
# ----------------------------------------------------------------------------
def memory_mha_forward(params, v, k, q, mask, num_heads,
                       *, compute_dtype=jnp.bfloat16):
    B, Sq, D = q.shape
    Sk = k.shape[1]
    depth = D // num_heads
    scale = 1.0 / math.sqrt(depth)
    cdt = compute_dtype
    approx = jnp.dtype(cdt) != jnp.dtype(jnp.float32)

    # Pre-transpose weights ONCE to (D_in, D_out) -> native MXU form in-kernel.
    def prep(p):
        w, b = p
        return (jnp.asarray(w.T, cdt), jnp.asarray(b, jnp.float32).reshape(1, -1))

    wq_p, wk_p, wv_p = prep(params["wq"]), prep(params["wk"]), prep(params["wv"])
    kw_p, vw_p, dense_p = prep(params["k_w"]), prep(params["v_w"]), prep(params["dense"])

    q2 = q.reshape(B * Sq, D).astype(cdt)
    k2 = k.reshape(B * Sk, D).astype(cdt)
    v2 = v.reshape(B * Sk, D).astype(cdt)

    # Fused Q/K/V projection: one pallas_call, three dots, shared M/N/K tiling.
    if Sq == Sk:
        qp2, kp2, vp2 = multi_linear([q2, k2, v2], [wq_p, wk_p, wv_p], out_dtype=cdt)
    else:
        (qp2,) = multi_linear([q2], [wq_p], out_dtype=cdt)
        kp2, vp2 = multi_linear([k2, v2], [wk_p, wv_p], out_dtype=cdt)

    qp = qp2.reshape(B, Sq, D)
    kp = kp2.reshape(B, Sk, D)
    vp = vp2.reshape(B, Sk, D)

    # Fused memory-token K/V projection (one small pallas_call).
    M = params["k_memory"].shape[1]
    km2, vm2 = multi_linear(
        [params["k_memory"].reshape(M, D).astype(cdt),
         params["v_memory"].reshape(M, D).astype(cdt)],
        [kw_p, vw_p], out_dtype=cdt)
    k_mem = km2.reshape(1, M, D)
    v_mem = vm2.reshape(1, M, D)

    # Attention: memory K/V passed separately (no HBM concat / batch broadcast),
    # no mask tensor when mask is None, mask never broadcast over heads.
    out, attention_weights = attention(
        qp, kp, vp, k_mem, v_mem, mask, num_heads, scale,
        approx_recip=approx, out_dtype=cdt)

    # Final dense projection (f32 accumulation; output in f32).
    (out2,) = multi_linear([out.reshape(B * Sq, D)], [dense_p],
                           out_dtype=jnp.float32)
    output = out2.reshape(B, Sq, D)
    return output, attention_weights


# ----------------------------------------------------------------------------
# Pure-JAX reference (for correctness check)
# ----------------------------------------------------------------------------
def reference_forward(params, v, k, q, mask, num_heads):
    B, Sq, D = q.shape
    depth = D // num_heads

    def lin(x, p):
        w, b = p
        return x @ w.T + b

    qp = lin(q, params["wq"])
    kp = lin(k, params["wk"])
    vp = lin(v, params["wv"])
    k_mem = lin(params["k_memory"], params["k_w"])
    v_mem = lin(params["v_memory"], params["v_w"])
    M = k_mem.shape[1]
    kcat = jnp.concatenate([kp, jnp.broadcast_to(k_mem, (B, M, D))], axis=1)
    vcat = jnp.concatenate([vp, jnp.broadcast_to(v_mem, (B, M, D))], axis=1)

    def split_heads(x):
        return x.reshape(B, x.shape[1], num_heads, depth).transpose(0, 2, 1, 3)

    qh, kh, vh = split_heads(qp), split_heads(kcat), split_heads(vcat)
    logits = jnp.einsum("bhqd,bhkd->bhqk", qh, kh) / math.sqrt(depth)
    if mask is not None:
        logits = logits + mask * -1e9
    w = jax.nn.softmax(logits, axis=-1)
    o = jnp.einsum("bhqk,bhkd->bhqd", w, vh)
    o = o.transpose(0, 2, 1, 3).reshape(B, Sq, D)
    return lin(o, params["dense"]), w


# ----------------------------------------------------------------------------
if __name__ == "__main__":
    B, S, d_model, num_heads, num_memory = 2, 8, 32, 4, 4

    root = jax.random.PRNGKey(0)
    kp_params, kq, kk, kv, kmsk = jax.random.split(root, 5)
    params = init_params(kp_params, d_model, num_memory)

    q = jax.random.normal(kq, (B, S, d_model), jnp.float32)
    k = jax.random.normal(kk, (B, S, d_model), jnp.float32)
    v = jax.random.normal(kv, (B, S, d_model), jnp.float32)
    Skt = S + num_memory

    # --- 1) f32 path, mask=None: tight parity with the reference -------------
    out, attn_w = memory_mha_forward(params, v, k, q, None, num_heads,
                                     compute_dtype=jnp.float32)
    out = jax.block_until_ready(out)
    attn_w = jax.block_until_ready(attn_w)
    ref_out, ref_w = reference_forward(params, v, k, q, None, num_heads)
    assert out.shape == (B, S, d_model)
    assert attn_w.shape == (B, num_heads, S, Skt)
    assert jnp.allclose(out, ref_out, atol=2e-4, rtol=2e-4)
    assert jnp.allclose(attn_w, ref_w, atol=2e-4, rtol=2e-4)

    # --- 2) f32 path with a (padding-style) mask ------------------------------
    mask = (jax.random.uniform(kmsk, (B, 1, 1, Skt)) > 0.7).astype(jnp.float32)
    out_m, w_m = memory_mha_forward(params, v, k, q, mask, num_heads,
                                    compute_dtype=jnp.float32)
    out_m = jax.block_until_ready(out_m)
    ref_out_m, ref_w_m = reference_forward(params, v, k, q, mask, num_heads)
    assert jnp.allclose(out_m, ref_out_m, atol=2e-4, rtol=2e-4)
    assert jnp.allclose(w_m, ref_w_m, atol=2e-4, rtol=2e-4)

    # --- 3) bf16 MXU path (performance default): relaxed tolerance -----------
    out_bf, w_bf = memory_mha_forward(params, v, k, q, None, num_heads,
                                      compute_dtype=jnp.bfloat16)
    out_bf = jax.block_until_ready(out_bf)
    assert jnp.allclose(out_bf.astype(jnp.float32), ref_out, atol=3e-2, rtol=3e-2)
    assert jnp.allclose(w_bf, ref_w, atol=3e-2, rtol=3e-2)

    print("KERNEL_OK")
</pallas_src>

<mosaic_0001>
module attributes {stable_mosaic.version = 11 : i64} {
  func.func @_multi_linear_kernel(%arg0: i32, %arg1: i32, %arg2: i32, %arg3: memref<16x32xf32, #tpu.memory_space<vmem>>, %arg4: memref<16x32xf32, #tpu.memory_space<vmem>>, %arg5: memref<16x32xf32, #tpu.memory_space<vmem>>, %arg6: memref<32x32xf32, #tpu.memory_space<vmem>>, %arg7: memref<32x32xf32, #tpu.memory_space<vmem>>, %arg8: memref<32x32xf32, #tpu.memory_space<vmem>>, %arg9: memref<1x32xf32, #tpu.memory_space<vmem>>, %arg10: memref<1x32xf32, #tpu.memory_space<vmem>>, %arg11: memref<1x32xf32, #tpu.memory_space<vmem>>, %arg12: memref<16x32xf32, #tpu.memory_space<vmem>>, %arg13: memref<16x32xf32, #tpu.memory_space<vmem>>, %arg14: memref<16x32xf32, #tpu.memory_space<vmem>>, %arg15: memref<16x32xf32, #tpu.memory_space<vmem>>, %arg16: memref<16x32xf32, #tpu.memory_space<vmem>>, %arg17: memref<16x32xf32, #tpu.memory_space<vmem>>) attributes {dimension_semantics = [#tpu.dimension_semantics<parallel>, #tpu.dimension_semantics<parallel>, #tpu.dimension_semantics<arbitrary>], iteration_bounds = array<i64: 1, 1, 1>, scalar_prefetch = 0 : i64, scratch_operands = 3 : i64, tpu.core_type = #tpu.core_type<tc>, window_params = [{transform_indices = @transform_0, window_bounds = array<i64: 16, 32>}, {transform_indices = @transform_1, window_bounds = array<i64: 16, 32>}, {transform_indices = @transform_2, window_bounds = array<i64: 16, 32>}, {transform_indices = @transform_3, window_bounds = array<i64: 32, 32>}, {transform_indices = @transform_4, window_bounds = array<i64: 32, 32>}, {transform_indices = @transform_5, window_bounds = array<i64: 32, 32>}, {transform_indices = @transform_6, window_bounds = array<i64: 1, 32>}, {transform_indices = @transform_7, window_bounds = array<i64: 1, 32>}, {transform_indices = @transform_8, window_bounds = array<i64: 1, 32>}, {transform_indices = @transform_9, window_bounds = array<i64: 16, 32>}, {transform_indices = @transform_10, window_bounds = array<i64: 16, 32>}, {transform_indices = @transform_11, window_bounds = array<i64: 16, 32>}]} {
    %c0_i32 = arith.constant 0 : i32
    %0 = arith.cmpi eq, %arg2, %c0_i32 : i32
    %1 = arith.extui %0 : i1 to i32
    %c0_i32_0 = arith.constant 0 : i32
    %2 = arith.cmpi ne, %1, %c0_i32_0 : i32
    scf.if %2 {
      %cst_36 = arith.constant 0.000000e+00 : f32
      %36 = vector.broadcast %cst_36 : f32 to vector<16x32xf32>
      %c0_37 = arith.constant 0 : index
      %c0_38 = arith.constant 0 : index
      %37 = vector.load %arg15[%c0_37, %c0_38] : memref<16x32xf32, #tpu.memory_space<vmem>>, vector<16x32xf32>
      tpu.vector_store %arg15[%c0_37, %c0_38], %36 {strides = array<i32>} : memref<16x32xf32, #tpu.memory_space<vmem>>, vector<16x32xf32>,
    } else {
    }
    %c0 = arith.constant 0 : index
    %c0_1 = arith.constant 0 : index
    %3 = vector.load %arg15[%c0, %c0_1] : memref<16x32xf32, #tpu.memory_space<vmem>>, vector<16x32xf32>
    %c0_2 = arith.constant 0 : index
    %c0_3 = arith.constant 0 : index
    %4 = vector.load %arg3[%c0_2, %c0_3] : memref<16x32xf32, #tpu.memory_space<vmem>>, vector<16x32xf32>
    %c0_4 = arith.constant 0 : index
    %c0_5 = arith.constant 0 : index
    %5 = vector.load %arg6[%c0_4, %c0_5] : memref<32x32xf32, #tpu.memory_space<vmem>>, vector<32x32xf32>
    %cst = arith.constant dense<0.000000e+00> : vector<16x32xf32>
    %6 = tpu.matmul %4, %5, %cst {dimension_numbers = #tpu.dot_dimension_numbers<[1], [0], [0], [1], [0, 0, 1, 1], [], []>} : vector<16x32xf32>, vector<32x32xf32>, vector<16x32xf32> -> vector<16x32xf32>
    %7 = arith.addf %3, %6 : vector<16x32xf32>
    %c0_6 = arith.constant 0 : index
    %c0_7 = arith.constant 0 : index
    %8 = vector.load %arg15[%c0_6, %c0_7] : memref<16x32xf32, #tpu.memory_space<vmem>>, vector<16x32xf32>
    tpu.vector_store %arg15[%c0_6, %c0_7], %7 {strides = array<i32>} : memref<16x32xf32, #tpu.memory_space<vmem>>, vector<16x32xf32>,
    %c0_i32_8 = arith.constant 0 : i32
    %9 = arith.cmpi eq, %arg2, %c0_i32_8 : i32
    %10 = arith.extui %9 : i1 to i32
    %c0_i32_9 = arith.constant 0 : i32
    %11 = arith.cmpi ne, %10, %c0_i32_9 : i32
    scf.if %11 {
      %c0_36 = arith.constant 0 : index
      %c0_37 = arith.constant 0 : index
      %36 = vector.load %arg15[%c0_36, %c0_37] : memref<16x32xf32, #tpu.memory_space<vmem>>, vector<16x32xf32>
      %c0_38 = arith.constant 0 : index
      %c0_39 = arith.constant 0 : index
      %37 = vector.load %arg9[%c0_38, %c0_39] : memref<1x32xf32, #tpu.memory_space<vmem>>, vector<1x32xf32>
      %38 = vector.broadcast %37 : vector<1x32xf32> to vector<16x32xf32>
      %39 = arith.addf %36, %38 : vector<16x32xf32>
      %c0_40 = arith.constant 0 : index
      %c0_41 = arith.constant 0 : index
      %40 = vector.load %arg12[%c0_40, %c0_41] : memref<16x32xf32, #tpu.memory_space<vmem>>, vector<16x32xf32>
      tpu.vector_store %arg12[%c0_40, %c0_41], %39 {strides = array<i32>} : memref<16x32xf32, #tpu.memory_space<vmem>>, vector<16x32xf32>,
    } else {
    }
    %c0_i32_10 = arith.constant 0 : i32
    %12 = arith.cmpi eq, %arg2, %c0_i32_10 : i32
    %13 = arith.extui %12 : i1 to i32
    %c0_i32_11 = arith.constant 0 : i32
    %14 = arith.cmpi ne, %13, %c0_i32_11 : i32
    scf.if %14 {
      %cst_36 = arith.constant 0.000000e+00 : f32
      %36 = vector.broadcast %cst_36 : f32 to vector<16x32xf32>
      %c0_37 = arith.constant 0 : index
      %c0_38 = arith.constant 0 : index
      %37 = vector.load %arg16[%c0_37, %c0_38] : memref<16x32xf32, #tpu.memory_space<vmem>>, vector<16x32xf32>
      tpu.vector_store %arg16[%c0_37, %c0_38], %36 {strides = array<i32>} : memref<16x32xf32, #tpu.memory_space<vmem>>, vector<16x32xf32>,
    } else {
    }
    %c0_12 = arith.constant 0 : index
    %c0_13 = arith.constant 0 : index
    %15 = vector.load %arg16[%c0_12, %c0_13] : memref<16x32xf32, #tpu.memory_space<vmem>>, vector<16x32xf32>
    %c0_14 = arith.constant 0 : index
    %c0_15 = arith.constant 0 : index
    %16 = vector.load %arg4[%c0_14, %c0_15] : memref<16x32xf32, #tpu.memory_space<vmem>>, vector<16x32xf32>
    %c0_16 = arith.constant 0 : index
    %c0_17 = arith.constant 0 : index
    %17 = vector.load %arg7[%c0_16, %c0_17] : memref<32x32xf32, #tpu.memory_space<vmem>>, vector<32x32xf32>
    %cst_18 = arith.constant dense<0.000000e+00> : vector<16x32xf32>
    %18 = tpu.matmul %16, %17, %cst_18 {dimension_numbers = #tpu.dot_dimension_numbers<[1], [0], [0], [1], [0, 0, 1, 1], [], []>} : vector<16x32xf32>, vector<32x32xf32>, vector<16x32xf32> -> vector<16x32xf32>
    %19 = arith.addf %15, %18 : vector<16x32xf32>
    %c0_19 = arith.constant 0 : index
    %c0_20 = arith.constant 0 : index
    %20 = vector.load %arg16[%c0_19, %c0_20] : memref<16x32xf32, #tpu.memory_space<vmem>>, vector<16x32xf32>
    tpu.vector_store %arg16[%c0_19, %c0_20], %19 {strides = array<i32>} : memref<16x32xf32, #tpu.memory_space<vmem>>, vector<16x32xf32>,
    %c0_i32_21 = arith.constant 0 : i32
    %21 = arith.cmpi eq, %arg2, %c0_i32_21 : i32
    %22 = arith.extui %21 : i1 to i32
    %c0_i32_22 = arith.constant 0 : i32
    %23 = arith.cmpi ne, %22, %c0_i32_22 : i32
    scf.if %23 {
      %c0_36 = arith.constant 0 : index
      %c0_37 = arith.constant 0 : index
      %36 = vector.load %arg16[%c0_36, %c0_37] : memref<16x32xf32, #tpu.memory_space<vmem>>, vector<16x32xf32>
      %c0_38 = arith.constant 0 : index
      %c0_39 = arith.constant 0 : index
      %37 = vector.load %arg10[%c0_38, %c0_39] : memref<1x32xf32, #tpu.memory_space<vmem>>, vector<1x32xf32>
      %38 = vector.broadcast %37 : vector<1x32xf32> to vector<16x32xf32>
      %39 = arith.addf %36, %38 : vector<16x32xf32>
      %c0_40 = arith.constant 0 : index
      %c0_41 = arith.constant 0 : index
      %40 = vector.load %arg13[%c0_40, %c0_41] : memref<16x32xf32, #tpu.memory_space<vmem>>, vector<16x32xf32>
      tpu.vector_store %arg13[%c0_40, %c0_41], %39 {strides = array<i32>} : memref<16x32xf32, #tpu.memory_space<vmem>>, vector<16x32xf32>,
    } else {
    }
    %c0_i32_23 = arith.constant 0 : i32
    %24 = arith.cmpi eq, %arg2, %c0_i32_23 : i32
    %25 = arith.extui %24 : i1 to i32
    %c0_i32_24 = arith.constant 0 : i32
    %26 = arith.cmpi ne, %25, %c0_i32_24 : i32
    scf.if %26 {
      %cst_36 = arith.constant 0.000000e+00 : f32
      %36 = vector.broadcast %cst_36 : f32 to vector<16x32xf32>
      %c0_37 = arith.constant 0 : index
      %c0_38 = arith.constant 0 : index
      %37 = vector.load %arg17[%c0_37, %c0_38] : memref<16x32xf32, #tpu.memory_space<vmem>>, vector<16x32xf32>
      tpu.vector_store %arg17[%c0_37, %c0_38], %36 {strides = array<i32>} : memref<16x32xf32, #tpu.memory_space<vmem>>, vector<16x32xf32>,
    } else {
    }
    %c0_25 = arith.constant 0 : index
    %c0_26 = arith.constant 0 : index
    %27 = vector.load %arg17[%c0_25, %c0_26] : memref<16x32xf32, #tpu.memory_space<vmem>>, vector<16x32xf32>
    %c0_27 = arith.constant 0 : index
    %c0_28 = arith.constant 0 : index
    %28 = vector.load %arg5[%c0_27, %c0_28] : memref<16x32xf32, #tpu.memory_space<vmem>>, vector<16x32xf32>
    %c0_29 = arith.constant 0 : index
    %c0_30 = arith.constant 0 : index
    %29 = vector.load %arg8[%c0_29, %c0_30] : memref<32x32xf32, #tpu.memory_space<vmem>>, vector<32x32xf32>
    %cst_31 = arith.constant dense<0.000000e+00> : vector<16x32xf32>
    %30 = tpu.matmul %28, %29, %cst_31 {dimension_numbers = #tpu.dot_dimension_numbers<[1], [0], [0], [1], [0, 0, 1, 1], [], []>} : vector<16x32xf32>, vector<32x32xf32>, vector<16x32xf32> -> vector<16x32xf32>
    %31 = arith.addf %27, %30 : vector<16x32xf32>
    %c0_32 = arith.constant 0 : index
    %c0_33 = arith.constant 0 : index
    %32 = vector.load %arg17[%c0_32, %c0_33] : memref<16x32xf32, #tpu.memory_space<vmem>>, vector<16x32xf32>
    tpu.vector_store %arg17[%c0_32, %c0_33], %31 {strides = array<i32>} : memref<16x32xf32, #tpu.memory_space<vmem>>, vector<16x32xf32>,
    %c0_i32_34 = arith.constant 0 : i32
    %33 = arith.cmpi eq, %arg2, %c0_i32_34 : i32
    %34 = arith.extui %33 : i1 to i32
    %c0_i32_35 = arith.constant 0 : i32
    %35 = arith.cmpi ne, %34, %c0_i32_35 : i32
    scf.if %35 {
      %c0_36 = arith.constant 0 : index
      %c0_37 = arith.constant 0 : index
      %36 = vector.load %arg17[%c0_36, %c0_37] : memref<16x32xf32, #tpu.memory_space<vmem>>, vector<16x32xf32>
      %c0_38 = arith.constant 0 : index
      %c0_39 = arith.constant 0 : index
      %37 = vector.load %arg11[%c0_38, %c0_39] : memref<1x32xf32, #tpu.memory_space<vmem>>, vector<1x32xf32>
      %38 = vector.broadcast %37 : vector<1x32xf32> to vector<16x32xf32>
      %39 = arith.addf %36, %38 : vector<16x32xf32>
      %c0_40 = arith.constant 0 : index
      %c0_41 = arith.constant 0 : index
      %40 = vector.load %arg14[%c0_40, %c0_41] : memref<16x32xf32, #tpu.memory_space<vmem>>, vector<16x32xf32>
      tpu.vector_store %arg14[%c0_40, %c0_41], %39 {strides = array<i32>} : memref<16x32xf32, #tpu.memory_space<vmem>>, vector<16x32xf32>,
    } else {
    }
    return
  }
  func.func @transform_0(%arg0: i32, %arg1: i32, %arg2: i32) -> (i32, i32) {
    %c0_i32 = arith.constant 0 : i32
    return %arg0, %arg2 : i32, i32
  }
  func.func @transform_1(%arg0: i32, %arg1: i32, %arg2: i32) -> (i32, i32) {
    %c0_i32 = arith.constant 0 : i32
    return %arg0, %arg2 : i32, i32
  }
  func.func @transform_2(%arg0: i32, %arg1: i32, %arg2: i32) -> (i32, i32) {
    %c0_i32 = arith.constant 0 : i32
    return %arg0, %arg2 : i32, i32
  }
  func.func @transform_3(%arg0: i32, %arg1: i32, %arg2: i32) -> (i32, i32) {
    %c0_i32 = arith.constant 0 : i32
    return %arg2, %arg1 : i32, i32
  }
  func.func @transform_4(%arg0: i32, %arg1: i32, %arg2: i32) -> (i32, i32) {
    %c0_i32 = arith.constant 0 : i32
    return %arg2, %arg1 : i32, i32
  }
  func.func @transform_5(%arg0: i32, %arg1: i32, %arg2: i32) -> (i32, i32) {
    %c0_i32 = arith.constant 0 : i32
    return %arg2, %arg1 : i32, i32
  }
  func.func @transform_6(%arg0: i32, %arg1: i32, %arg2: i32) -> (i32, i32) {
    %c0_i32 = arith.constant 0 : i32
    %c0_i32_0 = arith.constant 0 : i32
    return %c0_i32, %arg1 : i32, i32
  }
  func.func @transform_7(%arg0: i32, %arg1: i32, %arg2: i32) -> (i32, i32) {
    %c0_i32 = arith.constant 0 : i32
    %c0_i32_0 = arith.constant 0 : i32
    return %c0_i32, %arg1 : i32, i32
  }
  func.func @transform_8(%arg0: i32, %arg1: i32, %arg2: i32) -> (i32, i32) {
    %c0_i32 = arith.constant 0 : i32
    %c0_i32_0 = arith.constant 0 : i32
    return %c0_i32, %arg1 : i32, i32
  }
  func.func @transform_9(%arg0: i32, %arg1: i32, %arg2: i32) -> (i32, i32) {
    %c0_i32 = arith.constant 0 : i32
    return %arg0, %arg1 : i32, i32
  }
  func.func @transform_10(%arg0: i32, %arg1: i32, %arg2: i32) -> (i32, i32) {
    %c0_i32 = arith.constant 0 : i32
    return %arg0, %arg1 : i32, i32
  }
  func.func @transform_11(%arg0: i32, %arg1: i32, %arg2: i32) -> (i32, i32) {
    %c0_i32 = arith.constant 0 : i32
    return %arg0, %arg1 : i32, i32
  }
}

</mosaic_0001>

<bundles_post_ra>
// kernel: tpu_custom_call.1
= control target key start
LH: loop header
LB: loop body
LE: loop exit
PB: predicated region body
PF: predicated region fallthrough
CT: control target
= control target key end

     0   :  { %17 = vsyncpa [#allocation6], 0  ;;  %s774_s0 = inlined_call_operand.hbm [shape: f32[16,32], index: 0, kind: input, shape index: {}]   ;;  %s775_s1 = inlined_call_operand.hbm [shape: f32[16,32], index: 1, kind: input, shape index: {}]   ;;  %s776_s2 = inlined_call_operand.hbm [shape: f32[16,32], index: 2, kind: input, shape index: {}]   ;;  %s777_s3 = inlined_call_operand.hbm [shape: f32[32,32], index: 3, kind: input, shape index: {}]   ;;  %s778_s4 = inlined_call_operand.hbm [shape: f32[32,32], index: 4, kind: input, shape index: {}]   ;;  %s779_s5 = inlined_call_operand.hbm [shape: f32[32,32], index: 5, kind: input, shape index: {}]   ;;  %s780_s6 = inlined_call_operand.vmem [shape: f32[1,32], index: 6, kind: input, shape index: {}]   ;;  %s781_s7 = inlined_call_operand.vmem [shape: f32[1,32], index: 7, kind: input, shape index: {}]   ;;  %s782_s8 = inlined_call_operand.vmem [shape: f32[1,32], index: 8, kind: input, shape index: {}]   ;;  %s783_s9 = inlined_call_operand.hbm [shape: f32[16,32], index: 9, kind: output, shape index: {0}]   ;;  %s784_s10 = inlined_call_operand.hbm [shape: f32[16,32], index: 10, kind: output, shape index: {1}]   ;;  %s785_s11 = inlined_call_operand.hbm [shape: f32[16,32], index: 11, kind: output, shape index: {2}]  }
   0x1   :  { %18 = vsyncpa [#allocation9], 0 }
   0x2   :  { %19 = vsyncpa [#allocation12], 0 }
   0x3   :  { %20 = vsyncpa [#allocation15], 0 }
   0x4   :  { %21 = vsyncpa [#allocation7], 0 }
   0x5   :  { %22 = vsyncpa [#allocation18], 0  ;;  %s40_s19 = sshll.u32 %s775_s1, 4  ;;  %s615_s20 = smov [#allocation8]   ;;  %s41_s19 = int_to_ptr.hbm [resolvable:$true] %s40_s19 }
   0x6   :  { %s42_s21 = sshll.u32 %s615_s20, 4  ;;  %s66_s24 = sshll.u32 %s777_s3, 4  ;;  %s43_s21 = int_to_ptr.vmem [resolvable:$true] %s42_s21  ;;  %s67_s24 = int_to_ptr.hbm [resolvable:$true] %s66_s24 }
   0x7   :  { %s616_s25 = smov 128   ;;  %s617_s26 = smov 8  }
   0x8   :  { %48 = dma.hbm_to_vmem [thread:$0]  %s41_s19, 256, %s43_s21, [#allocation9], %s616_s25, %s616_s25, %s617_s26  }
   0x9   :  { %s618_s27 = smov [#allocation11]   ;;  %s27_s1 = sshll.u32 %s774_s0, 4  ;;  %s28_s1 = int_to_ptr.hbm [resolvable:$true] %s27_s1 }
   0xa   :  { %s68_s28 = sshll.u32 %s618_s27, 4  ;;  %s53_s13 = sshll.u32 %s776_s2, 4  ;;  %s69_s28 = int_to_ptr.vmem [resolvable:$true] %s68_s28  ;;  %s54_s13 = int_to_ptr.hbm [resolvable:$true] %s53_s13 }
   0xb   :  { %74 = dma.hbm_to_vmem [thread:$0]  %s67_s24, 512, %s69_s28, [#allocation12], %s616_s25, %s616_s25, %s617_s26  }
   0xc   :  { %s619_s14 = smov [#allocation5]   ;;  %s620_s16 = smov [#allocation10]  }
   0xd   :  { %s29_s15 = sshll.u32 %s619_s14, 4  ;;  %s55_s0 = sshll.u32 %s620_s16, 4  ;;  %s30_s15 = int_to_ptr.vmem [resolvable:$true] %s29_s15  ;;  %s56_s0 = int_to_ptr.vmem [resolvable:$true] %s55_s0 }
   0xe   :  { %35 = dma.hbm_to_vmem [thread:$0]  %s28_s1, 256, %s30_s15, [#allocation6], %s616_s25, %s616_s25, %s617_s26  }
   0xf   :  { %s79_s19 = sshll.u32 %s778_s4, 4  ;;  %s92_s21 = sshll.u32 %s779_s5, 4  ;;  %s80_s19 = int_to_ptr.hbm [resolvable:$true] %s79_s19  ;;  %s93_s21 = int_to_ptr.hbm [resolvable:$true] %s92_s21 }
  0x10   :  { %61 = dma.hbm_to_vmem [thread:$0]  %s54_s13, 256, %s56_s0, [#allocation9], %s616_s25, %s616_s25, %s617_s26  }
  0x11   :  { %s621_s22 = smov [#allocation13]   ;;  %s622_s24 = smov [#allocation14]  }
  0x12   :  { %s81_s23 = sshll.u32 %s621_s22, 4  ;;  %s94_s4 = sshll.u32 %s622_s24, 4  ;;  %s82_s23 = int_to_ptr.vmem [resolvable:$true] %s81_s23  ;;  %s95_s4 = int_to_ptr.vmem [resolvable:$true] %s94_s4 }
  0x13   :  { %87 = dma.hbm_to_vmem [thread:$0]  %s80_s19, 512, %s82_s23, [#allocation12], %s616_s25, %s616_s25, %s617_s26  }
  0x14   :  { %100 = dma.hbm_to_vmem [thread:$0]  %s93_s21, 512, %s95_s4, [#allocation15], %s616_s25, %s616_s25, %s617_s26  }
  0x15   :  { %603 = dma.done.wait [#allocation6], 256  }
  0x16   :  { %604 = vsyncadd [#allocation6], 4294967040 }
  0x17   :  { %605 = dma.done.wait [#allocation9], 512  }
  0x18   :  { %606 = vsyncadd [#allocation9], 4294966784 }
  0x19   :  { %607 = dma.done.wait [#allocation12], 1024  }
  0x1a   :  { %608 = vsyncadd [#allocation12], 4294966272 }
  0x1b   :  { %609 = dma.done.wait [#allocation15], 512  }
  0x1c   :  { %610 = vsyncadd [#allocation15], 4294966784  ;;  %vm135_vm0 = vcmask 261120   ;;  %v623_v0 = vmov 0.0   ;;  %v258_v1 = vld [vmem:[#allocation14 + $0x18] sm:$0xff]  ;;  %v257_v2 = vld [vmem:[#allocation14 + $0x10] sm:$0xff] }
  0x1d   :  { %193 = vst.msk [vmem:[#allocation3] sm:$0xff] %vm135_vm0, %v623_v0  ;;  %277 = vmatpush.msra.mxu2 %v258_v1  ;;  %v202_v3 = vld [vmem:[#allocation13 + $0x18] sm:$0xff]  ;;  %v201_v4 = vld [vmem:[#allocation13 + $0x10] sm:$0xff]  ;;  %v256_v5 = vld [vmem:[#allocation14 + $0x8] sm:$0xff]  ;;  %s311_s14 = sshll.u32 %s783_s9, 4  ;;  %s626_s9 = smov [#allocation19]   ;;  %s312_s14 = int_to_ptr.hbm [resolvable:$true] %s311_s14 }
  0x1e   :  { %136 = vst.msk [vmem:[#allocation2] sm:$0xff] %vm135_vm0, %v623_v0  ;;  %221 = vmatpush.msra.mxu1 %v202_v3  ;;  %v145_v6 = vld [vmem:[#allocation11 + $0x18] sm:$0xff]  ;;  %v200_v7 = vld [vmem:[#allocation13 + $0x8] sm:$0xff]  ;;  %v144_v8 = vld [vmem:[#allocation11 + $0x10] sm:$0xff]  ;;  %s335_s17 = sshll.u32 %s626_s9, 4  ;;  %s336_s17 = int_to_ptr.vmem [resolvable:$true] %s335_s17 }
  0x1f   :  { %137 = vst.msk [vmem:[#allocation2 + $0x8] sm:$0xff] %vm135_vm0, %v623_v0  ;;  %278 = vmatpush.msra.mxu2 %v257_v2  ;;  %368 = vmatpush.msra.mxu3 %v145_v6  ;;  %v255_v9 = vld [vmem:[#allocation14] sm:$0xff]  ;;  %v143_v10 = vld [vmem:[#allocation11 + $0x8] sm:$0xff]  ;;  %v253_v11 = vld [vmem:[#allocation10] sm:$0xff] }
  0x20   :  { %194 = vst.msk [vmem:[#allocation3 + $0x8] sm:$0xff] %vm135_vm0, %v623_v0  ;;  %222 = vmatpush.msra.mxu1 %v201_v4  ;;  %165 = vmatpush.msra.mxu0 %v145_v6  ;;  %v199_v12 = vld [vmem:[#allocation13] sm:$0xff]  ;;  %v141_v15 = vld [vmem:[#allocation5 + $0x8] sm:$0xff]  ;;  %v140_v16 = vld [vmem:[#allocation5] sm:$0xff] }
  0x21   :  { %249 = vst.msk [vmem:[#allocation4] sm:$0xff] %vm135_vm0, %v623_v0  ;;  %279 = vmatpush.msra.mxu2 %v256_v5  ;;  %369 = vmatpush.msra.mxu3 %v144_v8  ;;  %v197_v13 = vld [vmem:[#allocation8] sm:$0xff]  ;;  %v254_v17 = vld [vmem:[#allocation10 + $0x8] sm:$0xff]  ;;  %v198_v18 = vld [vmem:[#allocation8 + $0x8] sm:$0xff] }
  0x22   :  { %250 = vst.msk [vmem:[#allocation4 + $0x8] sm:$0xff] %vm135_vm0, %v623_v0  ;;  %223 = vmatpush.msra.mxu1 %v200_v7  ;;  %v142_v14 = vld [vmem:[#allocation11] sm:$0xff]  ;;  %166 = vmatpush.msra.mxu0 %v144_v8 }
  0x23   :  { %280 = vmatpush.msra.mxu2 %v255_v9  ;;  %370 = vmatpush.msra.mxu3 %v143_v10  ;;  %v384_v31 = vld [vmem:[%s781_s7] ss:$0 sm:$0xff]  ;;  %s624_s7 = smov [#allocation16]  }
  0x24   :  { %366 = vmatmul.msk.f32.vlgmr.msra.gmra.mxu2 %vm135_vm0, %v253_v11  ;;  %224 = vmatpush.msra.mxu1 %v199_v12  ;;  %v195_v19 = vld [vmem:[#allocation3] sm:$0xff]  ;;  %v385_v38 = vld [vmem:[%s780_s6] ss:$0 sm:$0xff]  ;;  %s309_s3 = sshll.u32 %s624_s7, 4  ;;  %s625_s6 = smov [#allocation17]   ;;  %s310_s3 = int_to_ptr.vmem [resolvable:$true] %s309_s3 }
  0x25   :  { %364 = vmatmul.msk.f32.vlgmr.msra.gmra.mxu1 %vm135_vm0, %v197_v13  ;;  %371 = vmatpush.msra.mxu3 %v142_v14  ;;  %v138_v22 = vld [vmem:[#allocation2] sm:$0xff]  ;;  %s322_s15 = sshll.u32 %s625_s6, 4  ;;  %s323_s15 = int_to_ptr.vmem [resolvable:$true] %s322_s15 }
  0x26   :  { %363 = vmatmul.msk.f32.vlgmr.msra.gmra.mxu3 %vm135_vm0, %v141_v15  ;;  %167 = vmatpush.msra.mxu0 %v143_v10  ;;  %v139_v27 = vld [vmem:[#allocation2 + $0x8] sm:$0xff]  ;;  %v386_v39 = vld [vmem:[%s782_s8] ss:$0 sm:$0xff]  ;;  %s324_s8 = sshll.u32 %s784_s10, 4  ;;  %s337_s10 = sshll.u32 %s785_s11, 4  ;;  %s325_s8 = int_to_ptr.hbm [resolvable:$true] %s324_s8  ;;  %s338_s10 = int_to_ptr.hbm [resolvable:$true] %s337_s10 }
  0x27   :  { %v196_v29 = vld [vmem:[#allocation3 + $0x8] sm:$0xff] }
  0x28   :  { %168 = vmatpush.msra.mxu0 %v142_v14  ;;  %v251_v23 = vld [vmem:[#allocation4] sm:$0xff] }
  0x29   :  { %362 = vmatmul.msk.f32.vlgmr.msra.gmra.mxu0 %vm135_vm0, %v140_v16  ;;  %v252_v36 = vld [vmem:[#allocation4 + $0x8] sm:$0xff] }
  0x2c   :  { %367 = vmatmul.msk.f32.gmra.mxu2 %vm135_vm0, %v254_v17 }
  0x2d   :  { %365 = vmatmul.msk.f32.gmra.mxu1 %vm135_vm0, %v198_v18 }
  0xa2   :  { %v226_v20 = vpop.f32.mrf.mxu1 }
  0xa3   :  { %v232_v21 = vadd.f32 %v226_v20, %v195_v19 }
  0xa5   :  { %234 = vst.msk [vmem:[#allocation3] sm:$0xff] %vm135_vm0, %v232_v21 }
  0xa6   :  { %v170_v24 = vpop.f32.mrf.mxu0 }
  0xa7   :  { %v282_v25 = vpop.f32.mrf.mxu2  ;;  %v176_v26 = vadd.f32 %v170_v24, %v138_v22 }
  0xa8   :  { %v288_v28 = vadd.f32 %v282_v25, %v251_v23 }
  0xa9   :  { %178 = vst.msk [vmem:[#allocation2] sm:$0xff] %vm135_vm0, %v176_v26  ;;  %v173_v30 = vpop.f32.mrf.mxu3 }
  0xaa   :  { %290 = vst.msk [vmem:[#allocation4] sm:$0xff] %vm135_vm0, %v288_v28  ;;  %v229_v32 = vpop.f32.mrf.mxu1  ;;  %v177_v33 = vadd.f32 %v173_v30, %v139_v27 }
  0xab   :  { %v233_v34 = vadd.f32 %v229_v32, %v196_v29 }
  0xac   :  { %179 = vst.msk [vmem:[#allocation2 + $0x8] sm:$0xff] %vm135_vm0, %v177_v33  ;;  %v239_v35 = vld [vmem:[#allocation3] sm:$0xff] }
  0xad   :  { %235 = vst.msk [vmem:[#allocation3 + $0x8] sm:$0xff] %vm135_vm0, %v233_v34  ;;  %v245_v37 = vadd.f32 %v384_v31, %v239_v35 }
  0xaf   :  { %v285_v40 = vpop.f32.mrf.mxu2  ;;  %247 = vst.msk [vmem:[#allocation17] sm:$0xff] %vm135_vm0, %v245_v37 }
  0xb0   :  { %v289_v41 = vadd.f32 %v285_v40, %v252_v36  ;;  %v183_v42 = vld [vmem:[#allocation2] sm:$0xff] }
  0xb1   :  { %v189_v43 = vadd.f32 %v385_v38, %v183_v42  ;;  %v295_v44 = vld [vmem:[#allocation4] sm:$0xff] }
  0xb2   :  { %291 = vst.msk [vmem:[#allocation4 + $0x8] sm:$0xff] %vm135_vm0, %v289_v41  ;;  %v301_v45 = vadd.f32 %v386_v39, %v295_v44 }
  0xb3   :  { %v184_v46 = vld [vmem:[#allocation2 + $0x8] sm:$0xff]  ;;  %191 = vst.msk [vmem:[#allocation16] sm:$0xff] %vm135_vm0, %v189_v43 }
  0xb4   :  { %v240_v47 = vld [vmem:[#allocation3 + $0x8] sm:$0xff]  ;;  %v190_v48 = vadd.f32 %v385_v38, %v184_v46  ;;  %303 = vst.msk [vmem:[#allocation19] sm:$0xff] %vm135_vm0, %v301_v45 }
  0xb5   :  { %v246_v49 = vadd.f32 %v384_v31, %v240_v47 }
  0xb6   :  { %192 = vst.msk [vmem:[#allocation16 + $0x8] sm:$0xff] %vm135_vm0, %v190_v48 }
  0xb7   :  { %248 = vst.msk [vmem:[#allocation17 + $0x8] sm:$0xff] %vm135_vm0, %v246_v49  ;;  %317 = dma.vmem_to_hbm [thread:$0]  %s310_s3, 256, %s312_s14, [#allocation7], %s616_s25, %s616_s25, %s617_s26  }
  0xb8   :  { %330 = dma.vmem_to_hbm [thread:$0]  %s323_s15, 256, %s325_s8, [#allocation18], %s616_s25, %s616_s25, %s617_s26  }
  0xb9   :  { %v296_v50 = vld [vmem:[#allocation4 + $0x8] sm:$0xff] }
  0xba   :  { %v302_v51 = vadd.f32 %v386_v39, %v296_v50 }
  0xbc   :  { %304 = vst.msk [vmem:[#allocation19 + $0x8] sm:$0xff] %vm135_vm0, %v302_v51 }
  0xbd   :  { %343 = dma.vmem_to_hbm [thread:$0]  %s336_s17, 256, %s338_s10, [#allocation18], %s616_s25, %s616_s25, %s617_s26  }
  0xbe   :  { %611 = dma.done.wait [#allocation7], 256  }
  0xbf   :  { %612 = vsyncadd [#allocation7], 4294967040 }
  0xc0   :  { %613 = dma.done.wait [#allocation18], 512  }
  0xc1   :  { %614 = vsyncadd [#allocation18], 4294966784 }
  0xc2   :  { %356 = vsyncpa [#allocation6], 1 }
  0xc3   :  { %357 = vsyncpa [#allocation9], 1 }
  0xc4   :  { %358 = vsyncpa [#allocation12], 1 }
  0xc5   :  { %359 = vsyncpa [#allocation15], 1 }
  0xc6   :  { %360 = vsyncpa [#allocation7], 1 }
  0xc7   :  { %361 = vsyncpa [#allocation18], 1 }

</bundles_post_ra>
